<compile_context>
chip_gen: v6e
topology: v6e:2x2x1
jax: 0.10.0
libtpu: 0.0.40
codegen_flags: <defaults>
</compile_context>

<pallas_src>
import functools

import jax
import jax.numpy as jnp
from jax.experimental import pallas as pl


# ----------------------------- Pallas kernel --------------------------------

def _causal_dilated_conv(h2d, w_flat, b, *, B, T, K, dilation):
    """Causal dilated Conv1d (+Chomp) as one tap-concatenated MXU contraction.

    h2d    : (B*T, C_in) f32 value, rows ordered (b, t) with batch stride T.
    w_flat : (K*C_in, C_out) f32, row index (k*C_in + c_in); tap k multiplies
             x[t - (K-1-k)*dilation]  (== Conv1d(padding=(K-1)*d) + Chomp1d).
    b      : (1, C_out) f32 bias.
    returns (B*T, C_out) f32.
    """
    C = h2d.shape[-1]
    h3 = h2d.reshape(B, T, C)
    taps = []
    for k in range(K):
        shift = (K - 1 - k) * dilation
        if shift == 0:
            taps.append(h3)
        else:
            zeros = jnp.zeros((B, shift, C), h3.dtype)
            taps.append(jnp.concatenate([zeros, h3[:, :T - shift, :]], axis=1))
    xk = jnp.concatenate(taps, axis=-1).reshape(B * T, K * C)
    return jnp.dot(xk, w_flat, preferred_element_type=jnp.float32) + b


def _tcn_kernel(*refs, B, T, K, layer_meta):
    """Entire TCN forward (all TemporalBlocks + output Linear) in one call.

    refs = [x] + per-layer [w1f, b1, w2f, b2, (wd, bd)?] + [lw_pad, lb_pad] + [out]
      x      : (B, T, C_in)
      w1f    : (K*C_in, C_mid)     b1 : (1, C_mid)
      w2f    : (K*C_mid, C_mid)    b2 : (1, C_mid)
      wd     : (C_in, C_mid)       bd : (1, C_mid)    [only if C_in != C_mid]
      lw_pad : (C_last, OUT_PAD)   lb_pad : (1, OUT_PAD)  [lane-dense padded]
      out    : (B, T, OUT_PAD)
    layer_meta: static tuple of (dilation, has_downsample) per TemporalBlock.
    """
    x_ref = refs[0]
    out_ref = refs[-1]
    w_refs = refs[1:-1]

    c0 = x_ref.shape[-1]
    h = x_ref[...].astype(jnp.float32).reshape(B * T, c0)

    i = 0
    for dilation, has_down in layer_meta:
        w1 = w_refs[i][...]
        b1 = w_refs[i + 1][...]
        w2 = w_refs[i + 2][...]
        b2 = w_refs[i + 3][...]
        i += 4
        # conv1 -> chomp -> ReLU   (dropout == identity at inference)
        h1 = _causal_dilated_conv(h, w1, b1, B=B, T=T, K=K, dilation=dilation)
        h1 = jnp.maximum(h1, 0.0)
        # conv2 -> chomp
        h2 = _causal_dilated_conv(h1, w2, b2, B=B, T=T, K=K, dilation=dilation)
        # residual (optional 1x1 downsample) + add + ReLU, fused epilogue
        if has_down:
            wd = w_refs[i][...]
            bd = w_refs[i + 1][...]
            i += 2
            res = jnp.dot(h, wd, preferred_element_type=jnp.float32) + bd
        else:
            res = h
        h = jnp.maximum(h2 + res, 0.0)

    # fused output Linear, padded to a lane-dense (multiple-of-128) width
    lw = w_refs[i][...]
    lb = w_refs[i + 1][...]
    y = jnp.dot(h, lw, preferred_element_type=jnp.float32) + lb
    out_ref[...] = y.reshape(B, T, -1).astype(out_ref.dtype)


# ------------------------------ wrapper --------------------------------------

def _round_up(n, m):
    return (n + m - 1) // m * m


def tcn_forward(x, params, dilations):
    """x: (B, T, input_size) (channel_last=True). Returns (B, T, output_size)."""
    B, T, _ = x.shape
    blocks = params["blocks"]
    K = blocks[0]["w1"].shape[0]
    out_dim = params["lin_w"].shape[1]
    out_pad = _round_up(out_dim, 128)  # lane-dense output store

    args = [x]
    layer_meta = []
    for p, d in zip(blocks, dilations):
        k_, c_in, c_mid = p["w1"].shape
        args += [p["w1"].reshape(k_ * c_in, c_mid), p["b1"],
                 p["w2"].reshape(k_ * c_mid, c_mid), p["b2"]]
        has_down = "wd" in p
        if has_down:
            args += [p["wd"], p["bd"]]
        layer_meta.append((int(d), has_down))

    lw_pad = jnp.zeros((params["lin_w"].shape[0], out_pad), params["lin_w"].dtype)
    lw_pad = lw_pad.at[:, :out_dim].set(params["lin_w"])
    lb_pad = jnp.zeros((1, out_pad), params["lin_b"].dtype)
    lb_pad = lb_pad.at[:, :out_dim].set(params["lin_b"])
    args += [lw_pad, lb_pad]

    kernel = functools.partial(
        _tcn_kernel, B=B, T=T, K=K, layer_meta=tuple(layer_meta))

    # Whole network in one grid-less pallas_call: every operand (weights plus
    # the (B,T,C) activation) is a full-array VMEM block; single invocation.
    # TODO(synk): for large B*T, tile the batch with a grid axis marked
    # "parallel" (halo-free: batch rows are independent) instead of one block.
    y_pad = pl.pallas_call(
        kernel,
        out_shape=jax.ShapeDtypeStruct((B, T, out_pad), x.dtype),
    )(*args)
    return y_pad[..., :out_dim]


# --------------------------- pure-jnp reference ------------------------------

def tcn_reference(x, params, dilations):
    """Independent jnp reference (explicit pad + per-tap einsum) for checking."""
    blocks = params["blocks"]
    K = blocks[0]["w1"].shape[0]

    def causal_conv(inp, w, b, d):
        B, T, _ = inp.shape
        pad = (K - 1) * d
        xp = jnp.pad(inp, ((0, 0), (pad, 0), (0, 0)))
        acc = jnp.zeros((B, T, w.shape[-1]), jnp.float32)
        for k in range(K):
            acc = acc + jnp.einsum("btc,cd->btd", xp[:, k * d:k * d + T, :], w[k])
        return acc + b[None]

    h = x
    for p, d in zip(blocks, dilations):
        h1 = jnp.maximum(causal_conv(h, p["w1"], p["b1"], d), 0.0)
        h2 = causal_conv(h1, p["w2"], p["b2"], d)
        if "wd" in p:
            res = jnp.einsum("btc,cd->btd", h, p["wd"]) + p["bd"][None]
        else:
            res = h
        h = jnp.maximum(h2 + res, 0.0)
    return jnp.einsum("btc,co->bto", h, params["lin_w"]) + params["lin_b"][None]


# ------------------------------ param init ----------------------------------

def weight_norm_effective(v, g):
    """weight_norm reparameterization: w = g * v / ||v|| (norm over dims 1,2).

    v: (C_out, C_in, K) PyTorch layout, g: (C_out,). Returns (K, C_in, C_out).
    """
    norm = jnp.sqrt(jnp.sum(v * v, axis=(1, 2), keepdims=True))
    w = g.reshape(-1, 1, 1) * v / norm
    return jnp.transpose(w, (2, 1, 0))  # -> (K, C_in, C_out)


def init_params(key, input_size, output_size, num_channels, kernel_size):
    params = {"blocks": []}
    dilations = []
    for i, out_ch in enumerate(num_channels):
        in_ch = input_size if i == 0 else num_channels[i - 1]
        dilation = 2 ** i
        dilations.append(dilation)
        key, k1, k2, k3, k4, k5, k6 = jax.random.split(key, 7)
        # conv weights ~ N(0, 0.01) as in init_weights(); weight_norm g = ||v||.
        v1 = 0.01 * jax.random.normal(k1, (out_ch, in_ch, kernel_size), jnp.float32)
        g1 = jnp.sqrt(jnp.sum(v1 * v1, axis=(1, 2)))
        v2 = 0.01 * jax.random.normal(k2, (out_ch, out_ch, kernel_size), jnp.float32)
        g2 = jnp.sqrt(jnp.sum(v2 * v2, axis=(1, 2)))
        # Conv1d default bias init: U(-1/sqrt(fan_in), 1/sqrt(fan_in))
        bnd1 = 1.0 / jnp.sqrt(in_ch * kernel_size)
        bnd2 = 1.0 / jnp.sqrt(out_ch * kernel_size)
        b1 = jax.random.uniform(k3, (1, out_ch), jnp.float32, -bnd1, bnd1)
        b2 = jax.random.uniform(k4, (1, out_ch), jnp.float32, -bnd2, bnd2)
        p = {
            "w1": weight_norm_effective(v1, g1),  # (K, C_in, C_out)
            "b1": b1,                             # (1, C_out)
            "w2": weight_norm_effective(v2, g2),  # (K, C_out, C_out)
            "b2": b2,                             # (1, C_out)
        }
        if in_ch != out_ch:
            vd = 0.01 * jax.random.normal(k5, (out_ch, in_ch, 1), jnp.float32)
            bndd = 1.0 / jnp.sqrt(in_ch)
            p["wd"] = jnp.transpose(vd[:, :, 0], (1, 0))  # (C_in, C_out)
            p["bd"] = jax.random.uniform(k6, (1, out_ch), jnp.float32, -bndd, bndd)
        params["blocks"].append(p)

    key, kl, kb = jax.random.split(key, 3)
    c_last = num_channels[-1]
    lin_w = 0.01 * jax.random.normal(kl, (output_size, c_last), jnp.float32)
    bndl = 1.0 / jnp.sqrt(c_last)
    lin_b = jax.random.uniform(kb, (1, output_size), jnp.float32, -bndl, bndl)
    params["lin_w"] = lin_w.T      # (C_last, output_size)
    params["lin_b"] = lin_b        # (1, output_size)
    return params, dilations


# --------------------------------- main --------------------------------------

if __name__ == "__main__":
    key = jax.random.PRNGKey(0)
    B, T = 2, 16
    input_size, output_size = 8, 4
    num_channels = [16, 32]
    kernel_size = 3

    key, kp, kx = jax.random.split(key, 3)
    params, dilations = init_params(kp, input_size, output_size, num_channels,
                                    kernel_size)

    # channel_last=True input, shape (B, T, input_size)
    x = jax.random.normal(kx, (B, T, input_size), jnp.float32)

    y = tcn_forward(x, params, dilations)
    jax.block_until_ready(y)
    assert y.shape == (B, T, output_size)

    y_ref = tcn_reference(x, params, dilations)
    err = float(jnp.max(jnp.abs(y - y_ref)))
    assert err < 1e-4, f"mismatch vs jnp reference: {err}"

    print("KERNEL_OK")
</pallas_src>

<mosaic_0001>
module attributes {stable_mosaic.version = 11 : i64} {
  func.func @_tcn_kernel(%arg0: memref<2x16x8xf32, #tpu.memory_space<vmem>>, %arg1: memref<24x16xf32, #tpu.memory_space<vmem>>, %arg2: memref<1x16xf32, #tpu.memory_space<vmem>>, %arg3: memref<48x16xf32, #tpu.memory_space<vmem>>, %arg4: memref<1x16xf32, #tpu.memory_space<vmem>>, %arg5: memref<8x16xf32, #tpu.memory_space<vmem>>, %arg6: memref<1x16xf32, #tpu.memory_space<vmem>>, %arg7: memref<48x32xf32, #tpu.memory_space<vmem>>, %arg8: memref<1x32xf32, #tpu.memory_space<vmem>>, %arg9: memref<96x32xf32, #tpu.memory_space<vmem>>, %arg10: memref<1x32xf32, #tpu.memory_space<vmem>>, %arg11: memref<16x32xf32, #tpu.memory_space<vmem>>, %arg12: memref<1x32xf32, #tpu.memory_space<vmem>>, %arg13: memref<32x128xf32, #tpu.memory_space<vmem>>, %arg14: memref<1x128xf32, #tpu.memory_space<vmem>>, %arg15: memref<2x16x128xf32, #tpu.memory_space<vmem>>) attributes {dimension_semantics = [], scalar_prefetch = 0 : i64, scratch_operands = 0 : i64, tpu.core_type = #tpu.core_type<tc>} {
    %c0 = arith.constant 0 : index
    %c0_0 = arith.constant 0 : index
    %c0_1 = arith.constant 0 : index
    %0 = vector.load %arg0[%c0, %c0_0, %c0_1] : memref<2x16x8xf32, #tpu.memory_space<vmem>>, vector<2x16x8xf32>
    %1 = vector.shape_cast %0 : vector<2x16x8xf32> to vector<32x8xf32>
    %c0_2 = arith.constant 0 : index
    %c0_3 = arith.constant 0 : index
    %2 = vector.load %arg1[%c0_2, %c0_3] : memref<24x16xf32, #tpu.memory_space<vmem>>, vector<24x16xf32>
    %c0_4 = arith.constant 0 : index
    %c0_5 = arith.constant 0 : index
    %3 = vector.load %arg2[%c0_4, %c0_5] : memref<1x16xf32, #tpu.memory_space<vmem>>, vector<1x16xf32>
    %c0_6 = arith.constant 0 : index
    %c0_7 = arith.constant 0 : index
    %4 = vector.load %arg3[%c0_6, %c0_7] : memref<48x16xf32, #tpu.memory_space<vmem>>, vector<48x16xf32>
    %c0_8 = arith.constant 0 : index
    %c0_9 = arith.constant 0 : index
    %5 = vector.load %arg4[%c0_8, %c0_9] : memref<1x16xf32, #tpu.memory_space<vmem>>, vector<1x16xf32>
    %6 = vector.shape_cast %1 : vector<32x8xf32> to vector<2x16x8xf32>
    %cst = arith.constant 0.000000e+00 : f32
    %7 = vector.broadcast %cst : f32 to vector<2x2x8xf32>
    %8 = vector.extract_strided_slice %6 {offsets = [0, 0, 0], sizes = [2, 14, 8], strides = [1, 1, 1]} : vector<2x16x8xf32> to vector<2x14x8xf32>
    %9 = tpu.concatenate %7, %8 in 1 : vector<2x2x8xf32>, vector<2x14x8xf32> -> vector<2x16x8xf32>
    %cst_10 = arith.constant 0.000000e+00 : f32
    %10 = vector.broadcast %cst_10 : f32 to vector<2x1x8xf32>
    %11 = vector.extract_strided_slice %6 {offsets = [0, 0, 0], sizes = [2, 15, 8], strides = [1, 1, 1]} : vector<2x16x8xf32> to vector<2x15x8xf32>
    %12 = tpu.concatenate %10, %11 in 1 : vector<2x1x8xf32>, vector<2x15x8xf32> -> vector<2x16x8xf32>
    %13 = tpu.concatenate %9, %12, %6 in 2 : vector<2x16x8xf32>, vector<2x16x8xf32>, vector<2x16x8xf32> -> vector<2x16x24xf32>
    %14 = vector.shape_cast %13 : vector<2x16x24xf32> to vector<32x24xf32>
    %cst_11 = arith.constant dense<0.000000e+00> : vector<32x16xf32>
    %15 = tpu.matmul %14, %2, %cst_11 {dimension_numbers = #tpu.dot_dimension_numbers<[1], [0], [0], [1], [0, 0, 1, 1], [], []>} : vector<32x24xf32>, vector<24x16xf32>, vector<32x16xf32> -> vector<32x16xf32>
    %16 = vector.broadcast %3 : vector<1x16xf32> to vector<32x16xf32>
    %17 = arith.addf %15, %16 : vector<32x16xf32>
    %cst_12 = arith.constant 0.000000e+00 : f32
    %18 = vector.broadcast %cst_12 : f32 to vector<32x16xf32>
    %19 = arith.maximumf %17, %18 : vector<32x16xf32>
    %20 = vector.shape_cast %19 : vector<32x16xf32> to vector<2x16x16xf32>
    %cst_13 = arith.constant 0.000000e+00 : f32
    %21 = vector.broadcast %cst_13 : f32 to vector<2x2x16xf32>
    %22 = vector.extract_strided_slice %20 {offsets = [0, 0, 0], sizes = [2, 14, 16], strides = [1, 1, 1]} : vector<2x16x16xf32> to vector<2x14x16xf32>
    %23 = tpu.concatenate %21, %22 in 1 : vector<2x2x16xf32>, vector<2x14x16xf32> -> vector<2x16x16xf32>
    %cst_14 = arith.constant 0.000000e+00 : f32
    %24 = vector.broadcast %cst_14 : f32 to vector<2x1x16xf32>
    %25 = vector.extract_strided_slice %20 {offsets = [0, 0, 0], sizes = [2, 15, 16], strides = [1, 1, 1]} : vector<2x16x16xf32> to vector<2x15x16xf32>
    %26 = tpu.concatenate %24, %25 in 1 : vector<2x1x16xf32>, vector<2x15x16xf32> -> vector<2x16x16xf32>
    %27 = tpu.concatenate %23, %26, %20 in 2 : vector<2x16x16xf32>, vector<2x16x16xf32>, vector<2x16x16xf32> -> vector<2x16x48xf32>
    %28 = vector.shape_cast %27 : vector<2x16x48xf32> to vector<32x48xf32>
    %cst_15 = arith.constant dense<0.000000e+00> : vector<32x16xf32>
    %29 = tpu.matmul %28, %4, %cst_15 {dimension_numbers = #tpu.dot_dimension_numbers<[1], [0], [0], [1], [0, 0, 1, 1], [], []>} : vector<32x48xf32>, vector<48x16xf32>, vector<32x16xf32> -> vector<32x16xf32>
    %30 = vector.broadcast %5 : vector<1x16xf32> to vector<32x16xf32>
    %31 = arith.addf %29, %30 : vector<32x16xf32>
    %c0_16 = arith.constant 0 : index
    %c0_17 = arith.constant 0 : index
    %32 = vector.load %arg5[%c0_16, %c0_17] : memref<8x16xf32, #tpu.memory_space<vmem>>, vector<8x16xf32>
    %c0_18 = arith.constant 0 : index
    %c0_19 = arith.constant 0 : index
    %33 = vector.load %arg6[%c0_18, %c0_19] : memref<1x16xf32, #tpu.memory_space<vmem>>, vector<1x16xf32>
    %cst_20 = arith.constant dense<0.000000e+00> : vector<32x16xf32>
    %34 = tpu.matmul %1, %32, %cst_20 {dimension_numbers = #tpu.dot_dimension_numbers<[1], [0], [0], [1], [0, 0, 1, 1], [], []>} : vector<32x8xf32>, vector<8x16xf32>, vector<32x16xf32> -> vector<32x16xf32>
    %35 = vector.broadcast %33 : vector<1x16xf32> to vector<32x16xf32>
    %36 = arith.addf %34, %35 : vector<32x16xf32>
    %37 = arith.addf %31, %36 : vector<32x16xf32>
    %cst_21 = arith.constant 0.000000e+00 : f32
    %38 = vector.broadcast %cst_21 : f32 to vector<32x16xf32>
    %39 = arith.maximumf %37, %38 : vector<32x16xf32>
    %c0_22 = arith.constant 0 : index
    %c0_23 = arith.constant 0 : index
    %40 = vector.load %arg7[%c0_22, %c0_23] : memref<48x32xf32, #tpu.memory_space<vmem>>, vector<48x32xf32>
    %c0_24 = arith.constant 0 : index
    %c0_25 = arith.constant 0 : index
    %41 = vector.load %arg8[%c0_24, %c0_25] : memref<1x32xf32, #tpu.memory_space<vmem>>, vector<1x32xf32>
    %c0_26 = arith.constant 0 : index
    %c0_27 = arith.constant 0 : index
    %42 = vector.load %arg9[%c0_26, %c0_27] : memref<96x32xf32, #tpu.memory_space<vmem>>, vector<96x32xf32>
    %c0_28 = arith.constant 0 : index
    %c0_29 = arith.constant 0 : index
    %43 = vector.load %arg10[%c0_28, %c0_29] : memref<1x32xf32, #tpu.memory_space<vmem>>, vector<1x32xf32>
    %44 = vector.shape_cast %39 : vector<32x16xf32> to vector<2x16x16xf32>
    %cst_30 = arith.constant 0.000000e+00 : f32
    %45 = vector.broadcast %cst_30 : f32 to vector<2x4x16xf32>
    %46 = vector.extract_strided_slice %44 {offsets = [0, 0, 0], sizes = [2, 12, 16], strides = [1, 1, 1]} : vector<2x16x16xf32> to vector<2x12x16xf32>
    %47 = tpu.concatenate %45, %46 in 1 : vector<2x4x16xf32>, vector<2x12x16xf32> -> vector<2x16x16xf32>
    %cst_31 = arith.constant 0.000000e+00 : f32
    %48 = vector.broadcast %cst_31 : f32 to vector<2x2x16xf32>
    %49 = vector.extract_strided_slice %44 {offsets = [0, 0, 0], sizes = [2, 14, 16], strides = [1, 1, 1]} : vector<2x16x16xf32> to vector<2x14x16xf32>
    %50 = tpu.concatenate %48, %49 in 1 : vector<2x2x16xf32>, vector<2x14x16xf32> -> vector<2x16x16xf32>
    %51 = tpu.concatenate %47, %50, %44 in 2 : vector<2x16x16xf32>, vector<2x16x16xf32>, vector<2x16x16xf32> -> vector<2x16x48xf32>
    %52 = vector.shape_cast %51 : vector<2x16x48xf32> to vector<32x48xf32>
    %cst_32 = arith.constant dense<0.000000e+00> : vector<32x32xf32>
    %53 = tpu.matmul %52, %40, %cst_32 {dimension_numbers = #tpu.dot_dimension_numbers<[1], [0], [0], [1], [0, 0, 1, 1], [], []>} : vector<32x48xf32>, vector<48x32xf32>, vector<32x32xf32> -> vector<32x32xf32>
    %54 = vector.broadcast %41 : vector<1x32xf32> to vector<32x32xf32>
    %55 = arith.addf %53, %54 : vector<32x32xf32>
    %cst_33 = arith.constant 0.000000e+00 : f32
    %56 = vector.broadcast %cst_33 : f32 to vector<32x32xf32>
    %57 = arith.maximumf %55, %56 : vector<32x32xf32>
    %58 = vector.shape_cast %57 : vector<32x32xf32> to vector<2x16x32xf32>
    %cst_34 = arith.constant 0.000000e+00 : f32
    %59 = vector.broadcast %cst_34 : f32 to vector<2x4x32xf32>
    %60 = vector.extract_strided_slice %58 {offsets = [0, 0, 0], sizes = [2, 12, 32], strides = [1, 1, 1]} : vector<2x16x32xf32> to vector<2x12x32xf32>
    %61 = tpu.concatenate %59, %60 in 1 : vector<2x4x32xf32>, vector<2x12x32xf32> -> vector<2x16x32xf32>
    %cst_35 = arith.constant 0.000000e+00 : f32
    %62 = vector.broadcast %cst_35 : f32 to vector<2x2x32xf32>
    %63 = vector.extract_strided_slice %58 {offsets = [0, 0, 0], sizes = [2, 14, 32], strides = [1, 1, 1]} : vector<2x16x32xf32> to vector<2x14x32xf32>
    %64 = tpu.concatenate %62, %63 in 1 : vector<2x2x32xf32>, vector<2x14x32xf32> -> vector<2x16x32xf32>
    %65 = tpu.concatenate %61, %64, %58 in 2 : vector<2x16x32xf32>, vector<2x16x32xf32>, vector<2x16x32xf32> -> vector<2x16x96xf32>
    %66 = vector.shape_cast %65 : vector<2x16x96xf32> to vector<32x96xf32>
    %cst_36 = arith.constant dense<0.000000e+00> : vector<32x32xf32>
    %67 = tpu.matmul %66, %42, %cst_36 {dimension_numbers = #tpu.dot_dimension_numbers<[1], [0], [0], [1], [0, 0, 1, 1], [], []>} : vector<32x96xf32>, vector<96x32xf32>, vector<32x32xf32> -> vector<32x32xf32>
    %68 = vector.broadcast %43 : vector<1x32xf32> to vector<32x32xf32>
    %69 = arith.addf %67, %68 : vector<32x32xf32>
    %c0_37 = arith.constant 0 : index
    %c0_38 = arith.constant 0 : index
    %70 = vector.load %arg11[%c0_37, %c0_38] : memref<16x32xf32, #tpu.memory_space<vmem>>, vector<16x32xf32>
    %c0_39 = arith.constant 0 : index
    %c0_40 = arith.constant 0 : index
    %71 = vector.load %arg12[%c0_39, %c0_40] : memref<1x32xf32, #tpu.memory_space<vmem>>, vector<1x32xf32>
    %cst_41 = arith.constant dense<0.000000e+00> : vector<32x32xf32>
    %72 = tpu.matmul %39, %70, %cst_41 {dimension_numbers = #tpu.dot_dimension_numbers<[1], [0], [0], [1], [0, 0, 1, 1], [], []>} : vector<32x16xf32>, vector<16x32xf32>, vector<32x32xf32> -> vector<32x32xf32>
    %73 = vector.broadcast %71 : vector<1x32xf32> to vector<32x32xf32>
    %74 = arith.addf %72, %73 : vector<32x32xf32>
    %75 = arith.addf %69, %74 : vector<32x32xf32>
    %cst_42 = arith.constant 0.000000e+00 : f32
    %76 = vector.broadcast %cst_42 : f32 to vector<32x32xf32>
    %77 = arith.maximumf %75, %76 : vector<32x32xf32>
    %c0_43 = arith.constant 0 : index
    %c0_44 = arith.constant 0 : index
    %78 = vector.load %arg13[%c0_43, %c0_44] : memref<32x128xf32, #tpu.memory_space<vmem>>, vector<32x128xf32>
    %c0_45 = arith.constant 0 : index
    %c0_46 = arith.constant 0 : index
    %79 = vector.load %arg14[%c0_45, %c0_46] : memref<1x128xf32, #tpu.memory_space<vmem>>, vector<1x128xf32>
    %cst_47 = arith.constant dense<0.000000e+00> : vector<32x128xf32>
    %80 = tpu.matmul %77, %78, %cst_47 {dimension_numbers = #tpu.dot_dimension_numbers<[1], [0], [0], [1], [0, 0, 1, 1], [], []>} : vector<32x32xf32>, vector<32x128xf32>, vector<32x128xf32> -> vector<32x128xf32>
    %81 = vector.broadcast %79 : vector<1x128xf32> to vector<32x128xf32>
    %82 = arith.addf %80, %81 : vector<32x128xf32>
    %83 = vector.shape_cast %82 : vector<32x128xf32> to vector<2x16x128xf32>
    %c0_48 = arith.constant 0 : index
    %c0_49 = arith.constant 0 : index
    %c0_50 = arith.constant 0 : index
    %84 = vector.load %arg15[%c0_48, %c0_49, %c0_50] : memref<2x16x128xf32, #tpu.memory_space<vmem>>, vector<2x16x128xf32>
    tpu.vector_store %arg15[%c0_48, %c0_49, %c0_50], %83 {strides = array<i32>} : memref<2x16x128xf32, #tpu.memory_space<vmem>>, vector<2x16x128xf32>,
    return
  }
}

</mosaic_0001>

<bundles_post_ra>
// kernel: tpu_custom_call.1
= control target key start
LH: loop header
LB: loop body
LE: loop exit
PB: predicated region body
PF: predicated region fallthrough
CT: control target
= control target key end

     0   :  { %vm83_vm0 = vcmask 1040384   ;;  %s1338_s24 = smov 16   ;;  %s1719_s0 = inlined_call_operand.vmem [shape: f32[2,16,8], index: 0, kind: input, shape index: {}]   ;;  %s1720_s1 = inlined_call_operand.vmem [shape: f32[24,16], index: 1, kind: input, shape index: {}]   ;;  %s1721_s2 = inlined_call_operand.vmem [shape: f32[1,16], index: 2, kind: input, shape index: {}]   ;;  %s1722_s3 = inlined_call_operand.vmem [shape: f32[48,16], index: 3, kind: input, shape index: {}]   ;;  %s1723_s4 = inlined_call_operand.vmem [shape: f32[1,16], index: 4, kind: input, shape index: {}]   ;;  %s1724_s5 = inlined_call_operand.vmem [shape: f32[8,16], index: 5, kind: input, shape index: {}]   ;;  %s1725_s6 = inlined_call_operand.vmem [shape: f32[1,16], index: 6, kind: input, shape index: {}]   ;;  %s1726_s7 = inlined_call_operand.vmem [shape: f32[48,32], index: 7, kind: input, shape index: {}]   ;;  %s1727_s8 = inlined_call_operand.vmem [shape: f32[1,32], index: 8, kind: input, shape index: {}]   ;;  %s1728_s9 = inlined_call_operand.vmem [shape: f32[96,32], index: 9, kind: input, shape index: {}]   ;;  %s1729_s10 = inlined_call_operand.vmem [shape: f32[1,32], index: 10, kind: input, shape index: {}]   ;;  %s1730_s11 = inlined_call_operand.vmem [shape: f32[16,32], index: 11, kind: input, shape index: {}]   ;;  %s1731_s12 = inlined_call_operand.vmem [shape: f32[1,32], index: 12, kind: input, shape index: {}]   ;;  %s1732_s13 = inlined_call_operand.vmem [shape: f32[32,128], index: 13, kind: input, shape index: {}]   ;;  %s1733_s14 = inlined_call_operand.vmem [shape: f32[1,128], index: 14, kind: input, shape index: {}]   ;;  %s1734_s15 = inlined_call_operand.hbm [shape: f32[2,16,128], index: 15, kind: output, shape index: {}]  }
   0x1   :  { %v1427_v0 = vld [vmem:[%s1719_s0] sm:$0xff]  ;;  %v1432_v1 = vld [vmem:[%s1719_s0 + $0x8] sm:$0xff]  ;;  %v1437_v2 = vld [vmem:[%s1719_s0 + $0x10] sm:$0xff] }
   0x2   :  { %108 = vrot.lane.b32.xlu1 %v1427_v0, %s1338_s24  ;;  %v84_v3 = vrot.slane %v1427_v0, 7  ;;  %v85_v4 = vrot.slane %v1432_v1, 7  ;;  %v1446_v5 = vld [vmem:[%s1719_s0 + $0x18] sm:$0xff]  ;;  %v57_v6 = vld [vmem:[%s1720_s1 + $0x10] sm:$0xff]  ;;  %v87_v7 = vrot.slane %v1437_v2, 7  ;;  %v56_v9 = vld [vmem:[%s1720_s1 + $0x8] sm:$0xff] }
   0x3   :  { %v88_v8 = vrot.slane %v1446_v5, 7  ;;  %1200 = vmatprep.subr.mxu0 %v57_v6  ;;  %v55_v11 = vld [vmem:[%s1720_s1] sm:$0xff] }
   0x4   :  { %v92_v10 = vsel %vm83_vm0, 0.0, %v84_v3  ;;  %1201 = vmatpush3.msra.mxu0 %v57_v6 }
   0x5   :  { %20 = vsyncpa [#allocation3], 0  ;;  %s1339_s0 = smov 8   ;;  %1202 = vmatprep.subr.mxu0 %v56_v9  ;;  %v86_v12 = vsel %vm83_vm0, %v84_v3, %v85_v4  ;;  %v89_v13 = vsel %vm83_vm0, %v87_v7, %v88_v8  ;;  %v93_v14 = vsel %vm83_vm0, 0.0, %v87_v7  ;;  %v71_v15 = vrot.slane %v1427_v0, 6  ;;  %v64_v39 = vld [vmem:[%s1722_s3 + $0x28] sm:$0xff] }
   0x6   :  { %96 = vrot.lane.b32.xlu0 %v92_v10, %s1339_s0  ;;  %110 = vrot.lane.b32.xlu1 %v1432_v1, %s1338_s24  ;;  %vm70_vm1 = vcmask 1041408   ;;  %v72_v17 = vrot.slane %v1432_v1, 6  ;;  %vm120_vm2 = vcmask 64512   ;;  %vm125_vm3 = vcmask 130048   ;;  %v63_v40 = vld [vmem:[%s1722_s3 + $0x20] sm:$0xff]  ;;  %v62_v41 = vld [vmem:[%s1722_s3 + $0x18] sm:$0xff] }
   0x7   :  { %1203 = vmatpush3.msra.mxu0 %v56_v9  ;;  %v81_v18 = vsel %vm70_vm1, 0.0, %v71_v15  ;;  %vm136_vm4 = vcmask 195584   ;;  %v74_v25 = vrot.slane %v1437_v2, 6  ;;  %v75_v26 = vrot.slane %v1446_v5, 6  ;;  %1212 = vmatprep.subr.mxu1 %v64_v39  ;;  %v61_v42 = vld [vmem:[%s1722_s3 + $0x10] sm:$0xff]  ;;  %v60_v43 = vld [vmem:[%s1722_s3 + $0x8] sm:$0xff] }
   0x8   :  { %1204 = vmatprep.subr.mxu0 %v55_v11  ;;  %v73_v23 = vsel %vm70_vm1, %v71_v15, %v72_v17  ;;  %1213 = vmatpush3.msra.mxu1 %v64_v39  ;;  %v403_v44 = vld [vmem:[%s1724_s5] sm:$0xff]  ;;  %vm294_vm5 = vcmask 261120   ;;  %vm305_vm6 = vcmask 392192   ;;  %vm536_vm7 = vcmask 1043456   ;;  %s1341_s18 = smov 64  }
   0x9   :  { %1205 = vmatpush3.msra.mxu0 %v55_v11  ;;  %v76_v30 = vsel %vm70_vm1, %v74_v25, %v75_v26  ;;  %v82_v32 = vsel %vm70_vm1, 0.0, %v74_v25  ;;  %1214 = vmatprep.subr.mxu1 %v63_v40  ;;  %v1103_v45 = vld [vmem:[%s1721_s2] ss:$0 sm:$0xff]  ;;  %s1340_s2 = smov 32   ;;  %vm756_vm8 = vcmask 523264   ;;  %vm767_vm9 = vcmask 785408  }
   0xa   :  { %98 = vrot.lane.b32.xlu0 %v86_v12, %s1339_s0  ;;  %102 = vrot.lane.b32.xlu1 %v89_v13, %s1339_s0  ;;  %v59_v46 = vld [vmem:[%s1722_s3] sm:$0xff] }
   0xb   :  { %1215 = vmatpush3.msra.mxu1 %v63_v40  ;;  %1230 = vmatprep.subr.mxu0 %v403_v44 }
   0xc   :  { %1216 = vmatprep.subr.mxu1 %v62_v41 }
   0xd   :  { %1217 = vmatpush3.msra.mxu1 %v62_v41 }
   0xe   :  { %100 = vrot.lane.b32.xlu0 %v93_v14, %s1339_s0  ;;  %114 = vrot.lane.b32.xlu1 %v1446_v5, %s1338_s24 }
   0xf   :  { %1218 = vmatprep.subr.mxu1 %v61_v42 }
  0x10   :  { %1219 = vmatpush3.msra.mxu1 %v61_v42 }
  0x11   :  { %1220 = vmatprep.subr.mxu1 %v60_v43 }
  0x12   :  { %112 = vrot.lane.b32.xlu0 %v1437_v2, %s1338_s24  ;;  %1221 = vmatpush3.msra.mxu1 %v60_v43 }
  0x13   :  { %1222 = vmatprep.subr.mxu1 %v59_v46 }
  0x14   :  { %1223 = vmatpush3.msra.mxu1 %v59_v46 }
  0x74   :  { %v109_v16 = vpop.permute.xlu1 %108 }
  0x78   :  { %v97_v19 = vpop.permute.xlu0 %96  ;;  %v111_v21 = vpop.permute.xlu1 %110 }
  0x79   :  { %v121_v20 = vsel %vm120_vm2, %v81_v18, %v97_v19 }
  0x7a   :  { %v126_v22 = vsel %vm125_vm3, %v121_v20, %v109_v16 }
  0x7b   :  { %1206 = vmatprep.mubr.msk.f32.mxu0 %vm136_vm4, %v126_v22 }
  0x7c   :  { %v99_v24 = vpop.permute.xlu0 %98  ;;  %v103_v28 = vpop.permute.xlu1 %102 }
  0x7d   :  { %v122_v27 = vsel %vm120_vm2, %v73_v23, %v99_v24  ;;  %v124_v33 = vsel %vm120_vm2, %v76_v30, %v103_v28  ;;  %v516_v28 = vld [vmem:[%s1726_s7 + $0x20] sm:$0xff] }
  0x7e   :  { %v127_v29 = vsel %vm125_vm3, %v122_v27, %v111_v21  ;;  %v517_v27 = vld [vmem:[%s1726_s7 + $0x28] sm:$0xff] }
  0x7f   :  { %1207 = vmatmul.mubr.msk.f32.vlgmr.msra.gmra.mxu0 %vm136_vm4, %v127_v29  ;;  %1238 = vmatprep.subr.mxu1 %v517_v27  ;;  %v515_v29 = vld [vmem:[%s1726_s7 + $0x18] sm:$0xff] }
  0x80   :  { %v101_v31 = vpop.permute.xlu0 %100  ;;  %v115_v34 = vpop.permute.xlu1 %114  ;;  %1231 = vmatpush3.msra.mxu0 %v403_v44 }
  0x81   :  { %v123_v35 = vsel %vm120_vm2, %v82_v32, %v101_v31  ;;  %v129_v38 = vsel %vm125_vm3, %v124_v33, %v115_v34  ;;  %v514_v31 = vld [vmem:[%s1726_s7 + $0x10] sm:$0xff]  ;;  %v1113_v32 = vld [vmem:[%s1725_s6] ss:$0 sm:$0xff] }
  0x82   :  { %v1108_v33 = vld [vmem:[%s1723_s4] ss:$0 sm:$0xff] }
  0x84   :  { %v113_v36 = vpop.permute.xlu0 %112 }
  0x85   :  { %v128_v37 = vsel %vm125_vm3, %v123_v35, %v113_v36  ;;  %v513_v36 = vld [vmem:[%s1726_s7 + $0x8] sm:$0xff] }
  0x86   :  { %1209 = vmatprep.mubr.msk.f32.mxu0 %vm136_vm4, %v128_v37 }
  0x87   :  { %1210 = vmatmul.mubr.msk.f32.gmra.mxu0 %vm136_vm4, %v129_v38  ;;  %v512_v38 = vld [vmem:[%s1726_s7] sm:$0xff] }
  0x88   :  { %1232 = vmatprep.mubr.msk.f32.mxu0 %vm120_vm2, %v1427_v0 }
  0x8b   :  { %1233 = vmatmul.mubr.msk.f32.vlgmr.msra.gmra.mxu0 %vm120_vm2, %v1432_v1 }
  0x8c   :  { %1235 = vmatprep.mubr.msk.f32.mxu0 %vm120_vm2, %v1437_v2 }
  0x8f   :  { %1236 = vmatmul.mubr.msk.f32.gmra.mxu0 %vm120_vm2, %v1446_v5 }
 0x13f   :  { %v1208_v47 = vpop.f32.mrf.mxu0 }
 0x140   :  { %v221_v48 = vadd.f32 %v1208_v47, %v1103_v45 }
 0x141   :  { %v215_v49 = vpop.f32.mrf.mxu0 }
 0x142   :  { %v235_v50 = vmax.f32 %v221_v48, 0.0  ;;  %v216_v51 = vadd.f32 %v1103_v45, %v215_v49 }
 0x144   :  { %v234_v52 = vmax.f32 %v216_v51, 0.0  ;;  %280 = vrot.lane.b32.xlu1 %v235_v50, %s1340_s2  ;;  %v243_v53 = vrot.slane %v235_v50, 6  ;;  %v255_v54 = vrot.slane %v235_v50, 7 }
 0x146   :  { %v242_v55 = vrot.slane %v234_v52, 6  ;;  %v254_v56 = vrot.slane %v234_v52, 7  ;;  %278 = vrot.lane.b32.xlu0 %v234_v52, %s1340_s2 }
 0x147   :  { %v1211_v57 = vpop.f32.mrf.mxu0 }
 0x148   :  { %v231_v58 = vadd.f32 %v1211_v57, %v1103_v45  ;;  %v256_v59 = vsel %vm83_vm0, %v254_v56, %v255_v54  ;;  %v262_v60 = vsel %vm83_vm0, 0.0, %v254_v56  ;;  %v244_v61 = vsel %vm70_vm1, %v242_v55, %v243_v53 }
 0x149   :  { %v225_v62 = vpop.f32.mrf.mxu0  ;;  %268 = vrot.lane.b32.xlu1 %v256_v59, %s1338_s24  ;;  %v252_v14 = vsel %vm70_vm1, 0.0, %v242_v55 }
 0x14a   :  { %v237_v63 = vmax.f32 %v231_v58, 0.0  ;;  %v226_v0 = vadd.f32 %v1103_v45, %v225_v62  ;;  %266 = vrot.lane.b32.xlu0 %v262_v60, %s1338_s24  ;;  %v866_v62 = vld [vmem:[%s1730_s11 + $0x8] sm:$0xff] }
 0x14b   :  { %v1234_v30 = vpop.f32.mrf.mxu0 }
 0x14c   :  { %v236_v1 = vmax.f32 %v226_v0, 0.0  ;;  %v246_v2 = vrot.slane %v237_v63, 6  ;;  %v258_v3 = vrot.slane %v237_v63, 7  ;;  %v491_v35 = vadd.f32 %v1234_v30, %v1113_v32  ;;  %v529_v30 = vld [vmem:[%s1728_s9 + $0x50] sm:$0xff] }
 0x14d   :  { %v485_v34 = vpop.f32.mrf.mxu0 }
 0x14e   :  { %v245_v4 = vrot.slane %v236_v1, 6  ;;  %v257_v5 = vrot.slane %v236_v1, 7  ;;  %v486_v40 = vadd.f32 %v1113_v32, %v485_v34  ;;  %v525_v34 = vld [vmem:[%s1728_s9 + $0x30] sm:$0xff] }
 0x14f   :  { %v1237_v46 = vpop.f32.mrf.mxu0 }
 0x150   :  { %v263_v6 = vsel %vm83_vm0, 0.0, %v257_v5  ;;  %v259_v7 = vsel %vm83_vm0, %v257_v5, %v258_v3  ;;  %v247_v8 = vsel %vm70_vm1, %v245_v4, %v246_v2  ;;  %v253_v20 = vsel %vm70_vm1, 0.0, %v245_v4 }
 0x151   :  { %270 = vrot.lane.b32.xlu0 %v263_v6, %s1338_s24  ;;  %272 = vrot.lane.b32.xlu1 %v259_v7, %s1338_s24  ;;  %v501_v48 = vadd.f32 %v1237_v46, %v1113_v32  ;;  %v495_v52 = vpop.f32.mrf.mxu0 }
 0x152   :  { %v496_v58 = vadd.f32 %v1113_v32, %v495_v52  ;;  %v527_v32 = vld [vmem:[%s1728_s9 + $0x40] sm:$0xff] }
 0x155   :  { %282 = vrot.lane.b32.xlu0 %v236_v1, %s1340_s2  ;;  %284 = vrot.lane.b32.xlu1 %v237_v63, %s1340_s2 }
 0x1b6   :  { %v281_v9 = vpop.permute.xlu1 %280 }
 0x1b8   :  { %v279_v10 = vpop.permute.xlu0 %278 }
 0x1bb   :  { %v269_v11 = vpop.permute.xlu1 %268 }
 0x1bc   :  { %v291_v12 = vsel %vm125_vm3, %v244_v61, %v269_v11  ;;  %v267_v13 = vpop.permute.xlu0 %266 }
 0x1bd   :  { %v290_v15 = vsel %vm125_vm3, %v252_v14, %v267_v13  ;;  %v296_v17 = vsel %vm294_vm5, %v291_v12, %v281_v9 }
 0x1be   :  { %v295_v16 = vsel %vm294_vm5, %v290_v15, %v279_v10 }
 0x1bf   :  { %1224 = vmatprep.mubr.msk.f32.mxu1 %vm305_vm6, %v295_v16  ;;  %v865_v16 = vld [vmem:[%s1730_s11] sm:$0xff] }
 0x1c0   :  { %1225 = vmatmul.mubr.msk.f32.vlgmr.msra.gmra.mxu1 %vm305_vm6, %v296_v17 }
 0x1c1   :  { %1239 = vmatpush3.msra.mxu1 %v517_v27 }
 0x1c2   :  { %1240 = vmatprep.subr.mxu1 %v516_v28 }
 0x1c3   :  { %v271_v18 = vpop.permute.xlu0 %270  ;;  %v273_v19 = vpop.permute.xlu1 %272  ;;  %1241 = vmatpush3.msra.mxu1 %v516_v28 }
 0x1c4   :  { %v292_v21 = vsel %vm125_vm3, %v253_v20, %v271_v18  ;;  %v293_v22 = vsel %vm125_vm3, %v247_v8, %v273_v19  ;;  %1242 = vmatprep.subr.mxu1 %v515_v29 }
 0x1c5   :  { %1243 = vmatpush3.msra.mxu1 %v515_v29  ;;  %v530_v29 = vld [vmem:[%s1728_s9 + $0x58] sm:$0xff] }
 0x1c6   :  { %1244 = vmatprep.subr.mxu1 %v514_v31  ;;  %1256 = vmatprep.subr.mxu0 %v530_v29 }
 0x1c7   :  { %v283_v23 = vpop.permute.xlu0 %282  ;;  %v285_v24 = vpop.permute.xlu1 %284  ;;  %1245 = vmatpush3.msra.mxu1 %v514_v31  ;;  %1257 = vmatpush3.msra.mxu0 %v530_v29  ;;  %v528_v31 = vld [vmem:[%s1728_s9 + $0x48] sm:$0xff] }
 0x1c8   :  { %v297_v25 = vsel %vm294_vm5, %v292_v21, %v283_v23  ;;  %v298_v26 = vsel %vm294_vm5, %v293_v22, %v285_v24  ;;  %1246 = vmatprep.subr.mxu1 %v513_v36  ;;  %1258 = vmatprep.subr.mxu0 %v529_v30 }
 0x1c9   :  { %1227 = vmatprep.mubr.msk.f32.mxu1 %vm305_vm6, %v297_v25  ;;  %1247 = vmatpush3.msra.mxu1 %v513_v36  ;;  %v523_v36 = vld [vmem:[%s1728_s9 + $0x20] sm:$0xff] }
 0x1ca   :  { %1228 = vmatmul.mubr.msk.f32.gmra.mxu1 %vm305_vm6, %v298_v26  ;;  %1248 = vmatprep.subr.mxu1 %v512_v38 }
 0x1cb   :  { %1249 = vmatpush3.msra.mxu1 %v512_v38  ;;  %1259 = vmatpush3.msra.mxu0 %v529_v30  ;;  %v521_v38 = vld [vmem:[%s1728_s9 + $0x10] sm:$0xff] }
 0x1cc   :  { %1286 = vmatprep.subr.mxu1 %v866_v62  ;;  %1260 = vmatprep.subr.mxu0 %v528_v31 }
 0x1cd   :  { %1261 = vmatpush3.msra.mxu0 %v528_v31 }
 0x1ce   :  { %1262 = vmatprep.subr.mxu0 %v527_v32 }
 0x1cf   :  { %1263 = vmatpush3.msra.mxu0 %v527_v32 }
 0x280   :  { %v1226_v37 = vpop.f32.mrf.mxu1 }
 0x281   :  { %v390_v39 = vadd.f32 %v1226_v37, %v1108_v33  ;;  %v522_v37 = vld [vmem:[%s1728_s9 + $0x18] sm:$0xff] }
 0x282   :  { %v384_v41 = vpop.f32.mrf.mxu1 }
 0x283   :  { %v505_v42 = vadd.f32 %v491_v35, %v390_v39  ;;  %v385_v43 = vadd.f32 %v1108_v33, %v384_v41  ;;  %v524_v35 = vld [vmem:[%s1728_s9 + $0x28] sm:$0xff]  ;;  %v519_v41 = vld [vmem:[%s1728_s9] sm:$0xff] }
 0x284   :  { %v520_v39 = vld [vmem:[%s1728_s9 + $0x8] sm:$0xff] }
 0x285   :  { %v1577_v44 = vmax.f32 %v505_v42, 0.0  ;;  %v504_v45 = vadd.f32 %v486_v40, %v385_v43  ;;  %v1118_v40 = vld [vmem:[%s1727_s8] ss:$0 sm:$0xff] }
 0x287   :  { %v1579_v47 = vmax.f32 %v504_v45, 0.0  ;;  %575 = vrot.lane.b32.xlu1 %v1577_v44, %s1340_s2  ;;  %v550_v50 = vrot.slane %v1577_v44, 6  ;;  %v538_v7 = vrot.slane %v1577_v44, 4 }
 0x289   :  { %573 = vrot.lane.b32.xlu0 %v1579_v47, %s1340_s2  ;;  %v549_v49 = vrot.slane %v1579_v47, 6  ;;  %v537_v5 = vrot.slane %v1579_v47, 4 }
 0x28a   :  { %v1229_v51 = vpop.f32.mrf.mxu1 }
 0x28b   :  { %v400_v53 = vadd.f32 %v1229_v51, %v1108_v33  ;;  %v551_v54 = vsel %vm70_vm1, %v549_v49, %v550_v50  ;;  %v557_v55 = vsel %vm70_vm1, 0.0, %v549_v49  ;;  %v539_v9 = vsel %vm536_vm7, %v537_v5, %v538_v7 }
 0x28c   :  { %v394_v56 = vpop.f32.mrf.mxu1  ;;  %563 = vrot.lane.b32.xlu1 %v551_v54, %s1338_s24  ;;  %v547_v12 = vsel %vm536_vm7, 0.0, %v537_v5 }
 0x28d   :  { %v507_v57 = vadd.f32 %v501_v48, %v400_v53  ;;  %v395_v59 = vadd.f32 %v1108_v33, %v394_v56  ;;  %561 = vrot.lane.b32.xlu0 %v557_v55, %s1338_s24  ;;  %v526_v33 = vld [vmem:[%s1728_s9 + $0x38] sm:$0xff] }
 0x28e   :  { %1264 = vmatprep.subr.mxu0 %v526_v33 }
 0x28f   :  { %v511_v60 = vmax.f32 %v507_v57, 0.0  ;;  %v506_v61 = vadd.f32 %v496_v58, %v395_v59  ;;  %1265 = vmatpush3.msra.mxu0 %v526_v33 }
 0x290   :  { %1266 = vmatprep.subr.mxu0 %v525_v34 }
 0x291   :  { %v510_v63 = vmax.f32 %v506_v61, 0.0  ;;  %v553_v1 = vrot.slane %v511_v60, 6  ;;  %v541_v20 = vrot.slane %v511_v60, 4  ;;  %1267 = vmatpush3.msra.mxu0 %v525_v34 }
 0x292   :  { %1268 = vmatprep.subr.mxu0 %v524_v35 }
 0x293   :  { %v552_v0 = vrot.slane %v510_v63, 6  ;;  %v540_v17 = vrot.slane %v510_v63, 4  ;;  %1269 = vmatpush3.msra.mxu0 %v524_v35 }
 0x294   :  { %1270 = vmatprep.subr.mxu0 %v523_v36 }
 0x295   :  { %v558_v2 = vsel %vm70_vm1, 0.0, %v552_v0  ;;  %v554_v3 = vsel %vm70_vm1, %v552_v0, %v553_v1  ;;  %v548_v21 = vsel %vm536_vm7, 0.0, %v540_v17  ;;  %v542_v22 = vsel %vm536_vm7, %v540_v17, %v541_v20  ;;  %1271 = vmatpush3.msra.mxu0 %v523_v36 }
 0x296   :  { %565 = vrot.lane.b32.xlu0 %v558_v2, %s1338_s24  ;;  %567 = vrot.lane.b32.xlu1 %v554_v3, %s1338_s24 }
 0x297   :  { %1272 = vmatprep.subr.mxu0 %v522_v37 }
 0x298   :  { %1273 = vmatpush3.msra.mxu0 %v522_v37 }
 0x299   :  { %1274 = vmatprep.subr.mxu0 %v521_v38 }
 0x29a   :  { %577 = vrot.lane.b32.xlu0 %v510_v63, %s1340_s2  ;;  %579 = vrot.lane.b32.xlu1 %v511_v60, %s1340_s2 }
 0x29b   :  { %1275 = vmatpush3.msra.mxu0 %v521_v38 }
 0x29c   :  { %1276 = vmatprep.subr.mxu0 %v520_v39 }
 0x29d   :  { %1277 = vmatpush3.msra.mxu0 %v520_v39 }
 0x29e   :  { %1278 = vmatprep.subr.mxu0 %v519_v41 }
 0x29f   :  { %1279 = vmatpush3.msra.mxu0 %v519_v41 }
 0x2f9   :  { %v576_v4 = vpop.permute.xlu1 %575 }
 0x2fb   :  { %v574_v6 = vpop.permute.xlu0 %573 }
 0x2fe   :  { %v564_v8 = vpop.permute.xlu1 %563 }
 0x2ff   :  { %v586_v10 = vsel %vm125_vm3, %v539_v9, %v564_v8  ;;  %v562_v11 = vpop.permute.xlu0 %561 }
 0x300   :  { %v585_v13 = vsel %vm125_vm3, %v547_v12, %v562_v11  ;;  %v590_v15 = vsel %vm294_vm5, %v586_v10, %v576_v4 }
 0x301   :  { %v589_v14 = vsel %vm294_vm5, %v585_v13, %v574_v6 }
 0x302   :  { %1250 = vmatprep.mubr.msk.f32.mxu1 %vm305_vm6, %v589_v14 }
 0x303   :  { %1251 = vmatmul.mubr.msk.f32.vlgmr.msra.gmra.mxu1 %vm305_vm6, %v590_v15 }
 0x304   :  { %1287 = vmatpush3.msra.mxu1 %v866_v62 }
 0x305   :  { %1288 = vmatprep.subr.mxu1 %v865_v16 }
 0x306   :  { %1289 = vmatpush3.msra.mxu1 %v865_v16 }
 0x308   :  { %v566_v18 = vpop.permute.xlu0 %565  ;;  %v568_v19 = vpop.permute.xlu1 %567 }
 0x309   :  { %v587_v23 = vsel %vm125_vm3, %v548_v21, %v566_v18  ;;  %v588_v24 = vsel %vm125_vm3, %v542_v22, %v568_v19  ;;  %v978_v22 = vld [vmem:[%s1732_s13 + $0x18] sm:$0xff] }
 0x30a   :  { %1296 = vmatprep.subr.mxu1 %v978_v22 }
 0x30c   :  { %v578_v25 = vpop.permute.xlu0 %577  ;;  %v580_v26 = vpop.permute.xlu1 %579 }
 0x30d   :  { %v591_v27 = vsel %vm294_vm5, %v587_v23, %v578_v25  ;;  %v592_v28 = vsel %vm294_vm5, %v588_v24, %v580_v26  ;;  %v977_v23 = vld [vmem:[%s1732_s13 + $0x10] sm:$0xff]  ;;  %v976_v24 = vld [vmem:[%s1732_s13 + $0x8] sm:$0xff]  ;;  %v975_v25 = vld [vmem:[%s1732_s13] sm:$0xff]  ;;  %s1342_s13 = smov [#allocation2]  }
 0x30e   :  { %1253 = vmatprep.mubr.msk.f32.mxu1 %vm305_vm6, %v591_v27  ;;  %v1123_v27 = vld [vmem:[%s1729_s10] ss:$0 sm:$0xff]  ;;  %s1092_s29 = sshll.u32 %s1342_s13, 4  ;;  %s1093_s29 = int_to_ptr.vmem [resolvable:$true] %s1092_s29 }
 0x30f   :  { %1254 = vmatmul.mubr.msk.f32.gmra.mxu1 %vm305_vm6, %v592_v28  ;;  %v1128_v28 = vld [vmem:[%s1731_s12] ss:$0 sm:$0xff]  ;;  %s1316_s30 = scalar_lea.vmem %s1093_s29, 512  ;;  %p1321_p1 = scmp.lt.s32.totalorder %s1093_s29, %s1093_s29 }
 0x310   :  { %1290 = vmatprep.mubr.msk.f32.mxu1 %vm125_vm3, %v1579_v47  ;;  %p1317_p0 = scmp.ne.s32.totalorder %s1093_s29, %s1316_s30  ;;  %p1322_p2 = scmp.lt.s32.totalorder %s1316_s30, %s1316_s30 }
 0x312   :  { %p1323_p3 = por %p1322_p2, %p1321_p1 }
 0x313   :  { %1291 = vmatmul.mubr.msk.f32.vlgmr.msra.gmra.mxu1 %vm125_vm3, %v1577_v44 }
 0x314   :  { %1293 = vmatprep.mubr.msk.f32.mxu1 %vm125_vm3, %v510_v63  ;;  %1297 = vmatpush3.msra.mxu1 %v978_v22  ;;  %p1324_p4 = pnand %p1323_p3, %p1317_p0 }
 0x315   :  { %1298 = vmatprep.subr.mxu1 %v977_v23 }
 0x316   :  { %1299 = vmatpush3.msra.mxu1 %v977_v23 }
 0x317   :  { %1294 = vmatmul.mubr.msk.f32.gmra.mxu1 %vm125_vm3, %v511_v60  ;;  %1300 = vmatprep.subr.mxu1 %v976_v24 }
 0x318   :  { %1301 = vmatpush3.msra.mxu1 %v976_v24 }
 0x319   :  { %1302 = vmatprep.subr.mxu1 %v975_v25 }
 0x31a   :  { %1303 = vmatpush3.msra.mxu1 %v975_v25 }
 0x3c3   :  { %v1252_v42 = vpop.f32.mrf.mxu1 }
 0x3c4   :  { %v683_v43 = vadd.f32 %v1252_v42, %v1118_v40 }
 0x3c5   :  { %v677_v44 = vpop.f32.mrf.mxu1 }
 0x3c6   :  { %v697_v45 = vmax.f32 %v683_v43, 0.0  ;;  %v678_v46 = vadd.f32 %v1118_v40, %v677_v44 }
 0x3c8   :  { %v696_v47 = vmax.f32 %v678_v46, 0.0  ;;  %742 = vrot.lane.b32.xlu1 %v697_v45, %s1341_s18  ;;  %v705_v48 = vrot.slane %v697_v45, 4  ;;  %v717_v49 = vrot.slane %v697_v45, 6 }
 0x3ca   :  { %v704_v50 = vrot.slane %v696_v47, 4  ;;  %v716_v51 = vrot.slane %v696_v47, 6  ;;  %740 = vrot.lane.b32.xlu0 %v696_v47, %s1341_s18 }
 0x3cc   :  { %v718_v52 = vsel %vm70_vm1, %v716_v51, %v717_v49  ;;  %v724_v53 = vsel %vm70_vm1, 0.0, %v716_v51  ;;  %v706_v54 = vsel %vm536_vm7, %v704_v50, %v705_v48  ;;  %v714_v9 = vsel %vm536_vm7, 0.0, %v704_v50 }
 0x3cd   :  { %730 = vrot.lane.b32.xlu1 %v718_v52, %s1340_s2  ;;  %v1133_v52 = vld [vmem:[%s1733_s14] ss:$0 sm:$0xff] }
 0x3ce   :  { %728 = vrot.lane.b32.xlu0 %v724_v53, %s1340_s2 }
 0x3cf   :  { %v1255_v55 = vpop.f32.mrf.mxu1 }
 0x3d0   :  { %v693_v56 = vadd.f32 %v1255_v55, %v1118_v40 }
 0x3d1   :  { %v687_v57 = vpop.f32.mrf.mxu1 }
 0x3d2   :  { %v699_v58 = vmax.f32 %v693_v56, 0.0  ;;  %v688_v59 = vadd.f32 %v1118_v40, %v687_v57 }
 0x3d3   :  { %v1292_v26 = vpop.f32.mrf.mxu1 }
 0x3d4   :  { %v698_v60 = vmax.f32 %v688_v59, 0.0  ;;  %v720_v61 = vrot.slane %v699_v58, 6  ;;  %v708_v0 = vrot.slane %v699_v58, 4  ;;  %v954_v32 = vadd.f32 %v1292_v26, %v1128_v28 }
 0x3d5   :  { %v948_v29 = vpop.f32.mrf.mxu1 }
 0x3d6   :  { %v707_v62 = vrot.slane %v698_v60, 4  ;;  %v719_v63 = vrot.slane %v698_v60, 6  ;;  %v949_v34 = vadd.f32 %v1128_v28, %v948_v29 }
 0x3d7   :  { %v1295_v40 = vpop.f32.mrf.mxu1 }
 0x3d8   :  { %v725_v1 = vsel %vm70_vm1, 0.0, %v719_v63  ;;  %v721_v2 = vsel %vm70_vm1, %v719_v63, %v720_v61  ;;  %v709_v3 = vsel %vm536_vm7, %v707_v62, %v708_v0  ;;  %v715_v15 = vsel %vm536_vm7, 0.0, %v707_v62 }
 0x3d9   :  { %732 = vrot.lane.b32.xlu0 %v725_v1, %s1340_s2  ;;  %734 = vrot.lane.b32.xlu1 %v721_v2, %s1340_s2  ;;  %v958_v41 = vpop.f32.mrf.mxu1  ;;  %v964_v44 = vadd.f32 %v1295_v40, %v1128_v28 }
 0x3da   :  { %v959_v46 = vadd.f32 %v1128_v28, %v958_v41 }
 0x3dd   :  { %744 = vrot.lane.b32.xlu0 %v698_v60, %s1341_s18  ;;  %746 = vrot.lane.b32.xlu1 %v699_v58, %s1341_s18 }
 0x43a   :  { %v743_v4 = vpop.permute.xlu1 %742 }
 0x43c   :  { %v741_v5 = vpop.permute.xlu0 %740 }
 0x43f   :  { %v731_v6 = vpop.permute.xlu1 %730 }
 0x440   :  { %v753_v7 = vsel %vm294_vm5, %v706_v54, %v731_v6  ;;  %v729_v8 = vpop.permute.xlu0 %728 }
 0x441   :  { %v752_v10 = vsel %vm294_vm5, %v714_v9, %v729_v8  ;;  %v758_v12 = vsel %vm756_vm8, %v753_v7, %v743_v4 }
 0x442   :  { %v757_v11 = vsel %vm756_vm8, %v752_v10, %v741_v5 }
 0x443   :  { %1280 = vmatprep.mubr.msk.f32.mxu0 %vm767_vm9, %v757_v11 }
 0x444   :  { %1281 = vmatmul.mubr.msk.f32.vlgmr.msra.gmra.mxu0 %vm767_vm9, %v758_v12 }
 0x44b   :  { %v733_v13 = vpop.permute.xlu0 %732  ;;  %v735_v14 = vpop.permute.xlu1 %734 }
 0x44c   :  { %v754_v16 = vsel %vm294_vm5, %v715_v15, %v733_v13  ;;  %v755_v17 = vsel %vm294_vm5, %v709_v3, %v735_v14 }
 0x44f   :  { %v745_v18 = vpop.permute.xlu0 %744  ;;  %v747_v19 = vpop.permute.xlu1 %746 }
 0x450   :  { %v759_v20 = vsel %vm756_vm8, %v754_v16, %v745_v18  ;;  %v760_v21 = vsel %vm756_vm8, %v755_v17, %v747_v19 }
 0x451   :  { %1283 = vmatprep.mubr.msk.f32.mxu0 %vm767_vm9, %v759_v20 }
 0x452   :  { %1284 = vmatmul.mubr.msk.f32.gmra.mxu0 %vm767_vm9, %v760_v21 }
 0x504   :  { %v1282_v30 = vpop.f32.mrf.mxu0 }
 0x505   :  { %v852_v31 = vadd.f32 %v1282_v30, %v1123_v27 }
 0x506   :  { %v846_v33 = vpop.f32.mrf.mxu0 }
 0x507   :  { %v847_v35 = vadd.f32 %v1123_v27, %v846_v33  ;;  %v968_v36 = vadd.f32 %v954_v32, %v852_v31 }
 0x509   :  { %v967_v37 = vadd.f32 %v949_v34, %v847_v35  ;;  %v972_v39 = vmax.f32 %v968_v36, 0.0 }
 0x50b   :  { %v971_v38 = vmax.f32 %v967_v37, 0.0 }
 0x50d   :  { %1304 = vmatprep.mubr.msk.f32.mxu1 %vm294_vm5, %v971_v38 }
 0x50e   :  { %1305 = vmatmul.mubr.msk.f32.vlgmr.msra.gmra.mxu1 %vm294_vm5, %v972_v39 }
 0x512   :  { %v1285_v42 = vpop.f32.mrf.mxu0 }
 0x513   :  { %v862_v43 = vadd.f32 %v1285_v42, %v1123_v27 }
 0x514   :  { %v856_v45 = vpop.f32.mrf.mxu0 }
 0x515   :  { %v857_v47 = vadd.f32 %v1123_v27, %v856_v45  ;;  %v970_v48 = vadd.f32 %v964_v44, %v862_v43 }
 0x517   :  { %v969_v49 = vadd.f32 %v959_v46, %v857_v47  ;;  %v974_v51 = vmax.f32 %v970_v48, 0.0 }
 0x519   :  { %v973_v50 = vmax.f32 %v969_v49, 0.0 }
 0x51b   :  { %1307 = vmatprep.mubr.msk.f32.mxu1 %vm294_vm5, %v973_v50 }
 0x51c   :  { %1308 = vmatmul.mubr.msk.f32.gmra.mxu1 %vm294_vm5, %v974_v51 }
 0x5ce   :  { %v1306_v53 = vpop.f32.mrf.mxu1 }
 0x5cf   :  { %v1070_v54 = vadd.f32 %v1306_v53, %v1133_v52 }
 0x5d0   :  { %v1064_v55 = vpop.f32.mrf.mxu1 }
 0x5d1   :  { %1084 = vst [vmem:[#allocation2 + $0x8] sm:$0xff] %v1070_v54  ;;  %v1065_v56 = vadd.f32 %v1133_v52, %v1064_v55 }
 0x5d3   :  { %1083 = vst [vmem:[#allocation2] sm:$0xff] %v1065_v56 }
 0x5dc   :  { %v1309_v57 = vpop.f32.mrf.mxu1 }
 0x5dd   :  { %v1080_v58 = vadd.f32 %v1309_v57, %v1133_v52 }
 0x5de   :  { %v1074_v59 = vpop.f32.mrf.mxu1 }
 0x5df   :  { %1086 = vst [vmem:[#allocation2 + $0x18] sm:$0xff] %v1080_v58  ;;  %v1075_v60 = vadd.f32 %v1133_v52, %v1074_v59 }
 0x5e1   :  { %1085 = vst [vmem:[#allocation2 + $0x10] sm:$0xff] %v1075_v60 }
 0x5e2   :  { %1327 = shalt.err (!%p1324_p4)
}
 0x5e3   :  { %s1343_s14 = smov 128  }
 0x5e4   :  { %1098 = dma.vmem_to_hbm [thread:$0]  %s1093_s29, 512, %s1734_s15, [#allocation3], %s1343_s14, %s1343_s14, %s1339_s0  }
 0x5e5   :  { %1336 = dma.done.wait [#allocation3], 512  }
 0x5e6   :  { %1337 = vsyncadd [#allocation3], 4294966784 }
 0x5e7   :  { %1102 = vsyncpa [#allocation3], 1 }

</bundles_post_ra>
